<compile_context>
chip_gen: v7x
topology: tpu7x:2x2x1
jax: 0.10.0
libtpu: 0.0.40
codegen_flags: <defaults>
</compile_context>

<pallas_src>
import functools

import numpy as np
import jax
import jax.numpy as jnp
from jax.experimental import pallas as pl
from jax.experimental.pallas import tpu as pltpu


# ----------------------------------------------------------------------------
# Fused Pallas kernel: entire DK forward for one batch element (both branches)
# ----------------------------------------------------------------------------
def _dk_fused_kernel(xf_ref, xe_ref, poolm_ref, mask_ref,
                     wkf_ref, wke_ref, wrf_ref, wre_ref,
                     wbf_ref, wbe_ref, shift_ref,
                     gf_ref, ge_ref, *, shifts):
    f32 = jnp.float32
    bf16 = jnp.bfloat16
    C, Cin = wrf_ref.shape
    n = xf_ref.shape[-1]                      # N = H*W lanes

    xf32 = xf_ref[...]                        # (Cin, N) f32, this batch element
    xe32 = xe_ref[...]
    xf = xf32.astype(bf16)
    xe = xe32.astype(bf16)

    # packed per-channel shifts: [bkf, bke, srf, sre, sbf, sbe, 0, 0]
    sh = shift_ref[...]
    bkf, bke = sh[:, 0:1], sh[:, 1:2]
    srf, sre = sh[:, 2:3], sh[:, 3:4]
    sbf, sbe = sh[:, 4:5], sh[:, 5:6]

    # --- adaptive avg-pool for BOTH branches with one (2Cin, N) x (N, T) matmul
    x_cat = jnp.concatenate([xf32, xe32], axis=0).astype(bf16)            # (2Cin, N)
    pooled = jnp.dot(x_cat, poolm_ref[...], preferred_element_type=f32)   # (2Cin, T)
    pool_f = pooled[:Cin].astype(bf16)
    pool_e = pooled[Cin:].astype(bf16)

    # --- dynamic-kernel generators: 1x1 conv + bias
    ker_f = jnp.dot(wkf_ref[...], pool_f, preferred_element_type=f32) + bkf   # (C, T)
    ker_e = jnp.dot(wke_ref[...], pool_e, preferred_element_type=f32) + bke

    # --- channel reduction: 1x1 conv + folded BN + ReLU (bf16 matmul, f32 acc)
    xf_r = jnp.maximum(
        jnp.dot(wrf_ref[...], xf, preferred_element_type=f32) + srf, 0.0)     # (C, N)
    xe_r = jnp.maximum(
        jnp.dot(wre_ref[...], xe, preferred_element_type=f32) + sre, 0.0)

    # --- depthwise cross-correlation: f/e stacked along sublanes so every tap
    #     is ONE roll (XLU) + one mul + one add (VPU).  The f branch is
    #     correlated with the e kernel and vice versa (matches the reference).
    x_stack = jnp.concatenate([xf_r, xe_r], axis=0)                       # (2C, N) f32
    k_stack = jnp.concatenate([ker_e, ker_f], axis=0)                     # (2C, T) f32
    mask = mask_ref[...]                                                  # (T, N)  f32

    acc = None
    for t, s in enumerate(shifts):
        # masked tap plane via rank-1 dot: per-row tap weight x border mask,
        # built off the accumulate path (static lane/sublane slices only).
        plane = jnp.dot(k_stack[:, t:t + 1], mask[t:t + 1, :],
                        preferred_element_type=f32)                       # (2C, N)
        shifted = pltpu.roll(x_stack, (-s) % n, axis=1) if (s % n) else x_stack
        term = shifted * plane
        acc = term if acc is None else acc + term

    guide_f = acc[:C].astype(bf16)
    guide_e = acc[C:].astype(bf16)

    # --- bottleneck: 1x1 conv + folded BN + ReLU; lane-dense (C, N) stores
    gf_ref[...] = jnp.maximum(
        jnp.dot(wbf_ref[...], guide_f, preferred_element_type=f32) + sbf, 0.0)
    ge_ref[...] = jnp.maximum(
        jnp.dot(wbe_ref[...], guide_e, preferred_element_type=f32) + sbe, 0.0)


# ----------------------------------------------------------------------------
# Host-side constant tables / weight folding
# ----------------------------------------------------------------------------
def _make_pool_matrix(H, W, out_size):
    """(H*W, out_size^2) matrix implementing torch adaptive_avg_pool2d."""
    P = np.zeros((H * W, out_size * out_size), np.float32)
    for bi in range(out_size):
        h0, h1 = (bi * H) // out_size, -(-((bi + 1) * H) // out_size)
        for bj in range(out_size):
            w0, w1 = (bj * W) // out_size, -(-((bj + 1) * W) // out_size)
            val = 1.0 / float((h1 - h0) * (w1 - w0))
            for h in range(h0, h1):
                for w in range(w0, w1):
                    P[h * W + w, bi * out_size + bj] = val
    return jnp.asarray(P)


def _make_corr_tables(H, W, fs):
    """Per-tap lane shift + validity mask for the padded depthwise correlation.

    Matches F.pad with p2d=(pad,pad,pad,pad) for odd fs and
    p2d=(pad+1, pad, pad+1, pad) -> extra padding on the LEFT/TOP for even fs.
    """
    pad = (fs - 1) // 2
    if (fs - 1) % 2 == 0:
        top = left = pad
    else:
        top = left = pad + 1
    mask = np.zeros((fs * fs, H * W), np.float32)
    shifts = []
    for i in range(fs):
        for j in range(fs):
            dh, dw = i - top, j - left
            shifts.append(dh * W + dw)
            t = i * fs + j
            for h in range(H):
                for w in range(W):
                    if 0 <= h + dh < H and 0 <= w + dw < W:
                        mask[t, h * W + w] = 1.0
    return jnp.asarray(mask), tuple(shifts)


def _fold_conv_bn(w_cin_cout, b, bn=None):
    """Fold conv bias + inference-mode BN into (W' (Cout,Cin), shift' (Cout,))."""
    w_oi = w_cin_cout.T                                      # (Cout, Cin)
    if bn is None:
        return w_oi, b
    gamma, beta, mean, var, eps = bn
    s = gamma / jnp.sqrt(var + eps)
    return w_oi * s[:, None], s * b + beta - s * mean


def build_dk_forward(params, filter_size, B, H, W):
    """Returns a jitted forward(xf, xe) -> (guide_f, guide_e), NCHW in/out."""
    Cin, C = params["redu_f"][0].shape
    N = H * W
    T = filter_size * filter_size

    poolm = _make_pool_matrix(H, W, filter_size).astype(jnp.bfloat16)    # (N, T)
    mask, shifts = _make_corr_tables(H, W, filter_size)                  # (T, N) f32

    def fold(name, bn_name=None):
        w_oi, shift = _fold_conv_bn(*params[name],
                                    bn=params[bn_name] if bn_name else None)
        return w_oi.astype(jnp.bfloat16), shift.astype(jnp.float32)

    wkf, bkf = fold("kernel_f")
    wke, bke = fold("kernel_e")
    wrf, srf = fold("redu_f", "redu_f_bn")
    wre, sre = fold("redu_e", "redu_e_bn")
    wbf, sbf = fold("bottle_f", "bottle_f_bn")
    wbe, sbe = fold("bottle_e", "bottle_e_bn")

    zeros = jnp.zeros((C,), jnp.float32)
    shift_pack = jnp.stack([bkf, bke, srf, sre, sbf, sbe, zeros, zeros],
                           axis=1)                                       # (C, 8)

    x_spec = pl.BlockSpec((None, Cin, N), lambda b: (b, 0, 0))
    out_spec = pl.BlockSpec((None, C, N), lambda b: (b, 0, 0))

    def const_spec(shape):
        return pl.BlockSpec(shape, lambda b: (0,) * len(shape))

    fused = pl.pallas_call(
        functools.partial(_dk_fused_kernel, shifts=shifts),
        out_shape=(jax.ShapeDtypeStruct((B, C, N), jnp.float32),
                   jax.ShapeDtypeStruct((B, C, N), jnp.float32)),
        grid=(B,),                               # one batch element per step
        in_specs=[x_spec, x_spec,
                  const_spec((N, T)), const_spec((T, N)),
                  const_spec((C, Cin)), const_spec((C, Cin)),
                  const_spec((C, Cin)), const_spec((C, Cin)),
                  const_spec((C, C)), const_spec((C, C)),
                  const_spec((C, 8))],
        out_specs=(out_spec, out_spec),
        compiler_params=pltpu.CompilerParams(
            dimension_semantics=("parallel",),   # megacore-shard the batch
            vmem_limit_bytes=32 * 1024 * 1024),
    )

    @jax.jit
    def forward(xf, xe):
        # NCHW -> (B, C, H*W) is a pure reshape (no transpose, no copy).
        gf, ge = fused(xf.reshape(B, Cin, N), xe.reshape(B, Cin, N),
                       poolm, mask,
                       wkf, wke, wrf, wre, wbf, wbe, shift_pack)
        return gf.reshape(B, C, H, W), ge.reshape(B, C, H, W)

    return forward


# ----------------------------------------------------------------------------
# Parameter init + independent pure-JAX reference (for self-check)
# ----------------------------------------------------------------------------
def init_dk_params(key, in_channels, channels):
    ks = iter(jax.random.split(key, 40))

    def conv_params(cin, cout):
        w = 0.1 * jax.random.normal(next(ks), (cin, cout), jnp.float32)
        b = 0.1 * jax.random.normal(next(ks), (cout,), jnp.float32)
        return w, b

    def bn_params(c):
        gamma = 1.0 + 0.1 * jax.random.normal(next(ks), (c,), jnp.float32)
        beta = 0.1 * jax.random.normal(next(ks), (c,), jnp.float32)
        mean = 0.1 * jax.random.normal(next(ks), (c,), jnp.float32)
        var = 1.0 + 0.1 * jnp.abs(jax.random.normal(next(ks), (c,), jnp.float32))
        return (gamma, beta, mean, var, 1e-5)

    p = {}
    p["kernel_f"] = conv_params(in_channels, channels)
    p["kernel_e"] = conv_params(in_channels, channels)
    p["redu_f"] = conv_params(in_channels, channels)
    p["redu_f_bn"] = bn_params(channels)
    p["redu_e"] = conv_params(in_channels, channels)
    p["redu_e_bn"] = bn_params(channels)
    p["bottle_f"] = conv_params(channels, channels)
    p["bottle_f_bn"] = bn_params(channels)
    p["bottle_e"] = conv_params(channels, channels)
    p["bottle_e_bn"] = bn_params(channels)
    return p


def _reference_forward(params, xf, xe, fs):
    """Independent pure-JAX (non-Pallas, f32) implementation of DK.forward."""
    def conv1x1(x, wb):
        w, b = wb
        return jnp.einsum('bchw,cd->bdhw', x, w) + b[None, :, None, None]

    def bn(x, p):
        gamma, beta, mean, var, eps = p
        s = gamma / jnp.sqrt(var + eps)
        return x * s[None, :, None, None] + (beta - mean * s)[None, :, None, None]

    def adaptive_pool(x, o):
        _, _, hh, ww = x.shape
        rows = []
        for i in range(o):
            h0, h1 = (i * hh) // o, -(-((i + 1) * hh) // o)
            cols = []
            for j in range(o):
                w0, w1 = (j * ww) // o, -(-((j + 1) * ww) // o)
                cols.append(jnp.mean(x[:, :, h0:h1, w0:w1], axis=(2, 3)))
            rows.append(jnp.stack(cols, axis=-1))
        return jnp.stack(rows, axis=-2)

    ker_f = conv1x1(adaptive_pool(xf, fs), params["kernel_f"])
    ker_e = conv1x1(adaptive_pool(xe, fs), params["kernel_e"])
    xf_r = jax.nn.relu(bn(conv1x1(xf, params["redu_f"]), params["redu_f_bn"]))
    xe_r = jax.nn.relu(bn(conv1x1(xe, params["redu_e"]), params["redu_e_bn"]))

    _, _, hh, ww = xf_r.shape
    pad = (fs - 1) // 2
    if (fs - 1) % 2 == 0:
        pl_, pr_, pt_, pb_ = pad, pad, pad, pad
    else:
        pl_, pr_, pt_, pb_ = pad + 1, pad, pad + 1, pad

    def dwcorr(x, k):
        xp = jnp.pad(x, ((0, 0), (0, 0), (pt_, pb_), (pl_, pr_)))
        out = jnp.zeros_like(x)
        for i in range(fs):
            for j in range(fs):
                out = out + xp[:, :, i:i + hh, j:j + ww] * k[:, :, i:i + 1, j:j + 1]
        return out

    g_f = dwcorr(xf_r, ker_e)
    g_e = dwcorr(xe_r, ker_f)
    g_f = jax.nn.relu(bn(conv1x1(g_f, params["bottle_f"]), params["bottle_f_bn"]))
    g_e = jax.nn.relu(bn(conv1x1(g_e, params["bottle_e"]), params["bottle_e_bn"]))
    return g_f, g_e


if __name__ == "__main__":
    B, IN_CH, CH, H, W, FS = 2, 8, 4, 16, 16, 3

    key = jax.random.PRNGKey(0)
    kx, ke, kp = jax.random.split(key, 3)
    xf = jax.random.normal(kx, (B, IN_CH, H, W), jnp.float32)
    xe = jax.random.normal(ke, (B, IN_CH, H, W), jnp.float32)
    params = init_dk_params(kp, IN_CH, CH)

    forward = build_dk_forward(params, FS, B, H, W)
    guide_f, guide_e = forward(xf, xe)
    jax.block_until_ready((guide_f, guide_e))

    assert guide_f.shape == (B, CH, H, W) and guide_e.shape == (B, CH, H, W)

    # numerical self-check against an independent pure-JAX f32 implementation
    # (tolerance accounts for the bf16 matmul inputs with f32 accumulation)
    ref_f, ref_e = _reference_forward(params, xf, xe, FS)
    err = max(float(jnp.max(jnp.abs(guide_f - ref_f))),
              float(jnp.max(jnp.abs(guide_e - ref_e))))
    assert err < 3e-2, f"kernel/reference mismatch: max abs err = {err}"
    print("KERNEL_OK")
</pallas_src>

<mosaic_0001>
module attributes {stable_mosaic.version = 11 : i64} {
  func.func @_dk_fused_kernel(%arg0: i32, %arg1: memref<1x8x256xf32, #tpu.memory_space<vmem>>, %arg2: memref<1x8x256xf32, #tpu.memory_space<vmem>>, %arg3: memref<256x9xbf16, #tpu.memory_space<vmem>>, %arg4: memref<9x256xf32, #tpu.memory_space<vmem>>, %arg5: memref<4x8xbf16, #tpu.memory_space<vmem>>, %arg6: memref<4x8xbf16, #tpu.memory_space<vmem>>, %arg7: memref<4x8xbf16, #tpu.memory_space<vmem>>, %arg8: memref<4x8xbf16, #tpu.memory_space<vmem>>, %arg9: memref<4x4xbf16, #tpu.memory_space<vmem>>, %arg10: memref<4x4xbf16, #tpu.memory_space<vmem>>, %arg11: memref<4x8xf32, #tpu.memory_space<vmem>>, %arg12: memref<1x4x256xf32, #tpu.memory_space<vmem>>, %arg13: memref<1x4x256xf32, #tpu.memory_space<vmem>>) attributes {dimension_semantics = [#tpu.dimension_semantics<parallel>], iteration_bounds = array<i64: 2>, scalar_prefetch = 0 : i64, scratch_operands = 0 : i64, tpu.core_type = #tpu.core_type<tc>, window_params = [{transform_indices = @transform_0, window_bounds = array<i64: 1, 8, 256>}, {transform_indices = @transform_1, window_bounds = array<i64: 1, 8, 256>}, {pipeline_mode = #tpu.pipeline_mode<synchronous>, transform_indices = @transform_2, window_bounds = array<i64: 256, 9>}, {pipeline_mode = #tpu.pipeline_mode<synchronous>, transform_indices = @transform_3, window_bounds = array<i64: 9, 256>}, {pipeline_mode = #tpu.pipeline_mode<synchronous>, transform_indices = @transform_4, window_bounds = array<i64: 4, 8>}, {pipeline_mode = #tpu.pipeline_mode<synchronous>, transform_indices = @transform_5, window_bounds = array<i64: 4, 8>}, {pipeline_mode = #tpu.pipeline_mode<synchronous>, transform_indices = @transform_6, window_bounds = array<i64: 4, 8>}, {pipeline_mode = #tpu.pipeline_mode<synchronous>, transform_indices = @transform_7, window_bounds = array<i64: 4, 8>}, {pipeline_mode = #tpu.pipeline_mode<synchronous>, transform_indices = @transform_8, window_bounds = array<i64: 4, 4>}, {pipeline_mode = #tpu.pipeline_mode<synchronous>, transform_indices = @transform_9, window_bounds = array<i64: 4, 4>}, {pipeline_mode = #tpu.pipeline_mode<synchronous>, transform_indices = @transform_10, window_bounds = array<i64: 4, 8>}, {transform_indices = @transform_11, window_bounds = array<i64: 1, 4, 256>}, {transform_indices = @transform_12, window_bounds = array<i64: 1, 4, 256>}]} {
    %c0 = arith.constant 0 : index
    %c0_0 = arith.constant 0 : index
    %c0_1 = arith.constant 0 : index
    %0 = vector.load %arg1[%c0, %c0_0, %c0_1] : memref<1x8x256xf32, #tpu.memory_space<vmem>>, vector<1x8x256xf32>
    %1 = vector.shape_cast %0 : vector<1x8x256xf32> to vector<8x256xf32>
    %c0_2 = arith.constant 0 : index
    %c0_3 = arith.constant 0 : index
    %c0_4 = arith.constant 0 : index
    %2 = vector.load %arg2[%c0_2, %c0_3, %c0_4] : memref<1x8x256xf32, #tpu.memory_space<vmem>>, vector<1x8x256xf32>
    %3 = vector.shape_cast %2 : vector<1x8x256xf32> to vector<8x256xf32>
    %4 = arith.truncf %1 : vector<8x256xf32> to vector<8x256xbf16>
    %5 = arith.truncf %3 : vector<8x256xf32> to vector<8x256xbf16>
    %c0_5 = arith.constant 0 : index
    %c0_6 = arith.constant 0 : index
    %6 = vector.load %arg11[%c0_5, %c0_6] : memref<4x8xf32, #tpu.memory_space<vmem>>, vector<4x8xf32>
    %7 = vector.extract_strided_slice %6 {offsets = [0, 0], sizes = [4, 1], strides = [1, 1]} : vector<4x8xf32> to vector<4x1xf32>
    %8 = vector.extract_strided_slice %6 {offsets = [0, 1], sizes = [4, 1], strides = [1, 1]} : vector<4x8xf32> to vector<4x1xf32>
    %9 = vector.extract_strided_slice %6 {offsets = [0, 2], sizes = [4, 1], strides = [1, 1]} : vector<4x8xf32> to vector<4x1xf32>
    %10 = vector.extract_strided_slice %6 {offsets = [0, 3], sizes = [4, 1], strides = [1, 1]} : vector<4x8xf32> to vector<4x1xf32>
    %11 = vector.extract_strided_slice %6 {offsets = [0, 4], sizes = [4, 1], strides = [1, 1]} : vector<4x8xf32> to vector<4x1xf32>
    %12 = vector.extract_strided_slice %6 {offsets = [0, 5], sizes = [4, 1], strides = [1, 1]} : vector<4x8xf32> to vector<4x1xf32>
    %13 = tpu.concatenate %1, %3 in 0 : vector<8x256xf32>, vector<8x256xf32> -> vector<16x256xf32>
    %14 = arith.truncf %13 : vector<16x256xf32> to vector<16x256xbf16>
    %c0_7 = arith.constant 0 : index
    %c0_8 = arith.constant 0 : index
    %15 = vector.load %arg3[%c0_7, %c0_8] : memref<256x9xbf16, #tpu.memory_space<vmem>>, vector<256x9xbf16>
    %cst = arith.constant dense<0.000000e+00> : vector<16x9xf32>
    %16 = tpu.matmul %14, %15, %cst {dimension_numbers = #tpu.dot_dimension_numbers<[1], [0], [0], [1], [0, 0, 1, 1], [], []>} : vector<16x256xbf16>, vector<256x9xbf16>, vector<16x9xf32> -> vector<16x9xf32>
    %17 = vector.extract_strided_slice %16 {offsets = [0, 0], sizes = [8, 9], strides = [1, 1]} : vector<16x9xf32> to vector<8x9xf32>
    %18 = arith.truncf %17 : vector<8x9xf32> to vector<8x9xbf16>
    %19 = vector.extract_strided_slice %16 {offsets = [8, 0], sizes = [8, 9], strides = [1, 1]} : vector<16x9xf32> to vector<8x9xf32>
    %20 = arith.truncf %19 : vector<8x9xf32> to vector<8x9xbf16>
    %c0_9 = arith.constant 0 : index
    %c0_10 = arith.constant 0 : index
    %21 = vector.load %arg5[%c0_9, %c0_10] : memref<4x8xbf16, #tpu.memory_space<vmem>>, vector<4x8xbf16>
    %cst_11 = arith.constant dense<0.000000e+00> : vector<4x9xf32>
    %22 = tpu.matmul %21, %18, %cst_11 {dimension_numbers = #tpu.dot_dimension_numbers<[1], [0], [0], [1], [0, 0, 1, 1], [], []>} : vector<4x8xbf16>, vector<8x9xbf16>, vector<4x9xf32> -> vector<4x9xf32>
    %23 = vector.broadcast %7 : vector<4x1xf32> to vector<4x9xf32>
    %24 = arith.addf %22, %23 : vector<4x9xf32>
    %c0_12 = arith.constant 0 : index
    %c0_13 = arith.constant 0 : index
    %25 = vector.load %arg6[%c0_12, %c0_13] : memref<4x8xbf16, #tpu.memory_space<vmem>>, vector<4x8xbf16>
    %cst_14 = arith.constant dense<0.000000e+00> : vector<4x9xf32>
    %26 = tpu.matmul %25, %20, %cst_14 {dimension_numbers = #tpu.dot_dimension_numbers<[1], [0], [0], [1], [0, 0, 1, 1], [], []>} : vector<4x8xbf16>, vector<8x9xbf16>, vector<4x9xf32> -> vector<4x9xf32>
    %27 = vector.broadcast %8 : vector<4x1xf32> to vector<4x9xf32>
    %28 = arith.addf %26, %27 : vector<4x9xf32>
    %c0_15 = arith.constant 0 : index
    %c0_16 = arith.constant 0 : index
    %29 = vector.load %arg7[%c0_15, %c0_16] : memref<4x8xbf16, #tpu.memory_space<vmem>>, vector<4x8xbf16>
    %cst_17 = arith.constant dense<0.000000e+00> : vector<4x256xf32>
    %30 = tpu.matmul %29, %4, %cst_17 {dimension_numbers = #tpu.dot_dimension_numbers<[1], [0], [0], [1], [0, 0, 1, 1], [], []>} : vector<4x8xbf16>, vector<8x256xbf16>, vector<4x256xf32> -> vector<4x256xf32>
    %31 = vector.broadcast %9 : vector<4x1xf32> to vector<4x256xf32>
    %32 = arith.addf %30, %31 : vector<4x256xf32>
    %cst_18 = arith.constant 0.000000e+00 : f32
    %33 = vector.broadcast %cst_18 : f32 to vector<4x256xf32>
    %34 = arith.maximumf %32, %33 : vector<4x256xf32>
    %c0_19 = arith.constant 0 : index
    %c0_20 = arith.constant 0 : index
    %35 = vector.load %arg8[%c0_19, %c0_20] : memref<4x8xbf16, #tpu.memory_space<vmem>>, vector<4x8xbf16>
    %cst_21 = arith.constant dense<0.000000e+00> : vector<4x256xf32>
    %36 = tpu.matmul %35, %5, %cst_21 {dimension_numbers = #tpu.dot_dimension_numbers<[1], [0], [0], [1], [0, 0, 1, 1], [], []>} : vector<4x8xbf16>, vector<8x256xbf16>, vector<4x256xf32> -> vector<4x256xf32>
    %37 = vector.broadcast %10 : vector<4x1xf32> to vector<4x256xf32>
    %38 = arith.addf %36, %37 : vector<4x256xf32>
    %cst_22 = arith.constant 0.000000e+00 : f32
    %39 = vector.broadcast %cst_22 : f32 to vector<4x256xf32>
    %40 = arith.maximumf %38, %39 : vector<4x256xf32>
    %41 = tpu.concatenate %34, %40 in 0 : vector<4x256xf32>, vector<4x256xf32> -> vector<8x256xf32>
    %42 = tpu.concatenate %28, %24 in 0 : vector<4x9xf32>, vector<4x9xf32> -> vector<8x9xf32>
    %c0_23 = arith.constant 0 : index
    %c0_24 = arith.constant 0 : index
    %43 = vector.load %arg4[%c0_23, %c0_24] : memref<9x256xf32, #tpu.memory_space<vmem>>, vector<9x256xf32>
    %44 = vector.extract_strided_slice %42 {offsets = [0, 0], sizes = [8, 1], strides = [1, 1]} : vector<8x9xf32> to vector<8x1xf32>
    %45 = vector.extract_strided_slice %43 {offsets = [0, 0], sizes = [1, 256], strides = [1, 1]} : vector<9x256xf32> to vector<1x256xf32>
    %cst_25 = arith.constant dense<0.000000e+00> : vector<8x256xf32>
    %46 = tpu.matmul %44, %45, %cst_25 {dimension_numbers = #tpu.dot_dimension_numbers<[1], [0], [0], [1], [0, 0, 1, 1], [], []>} : vector<8x1xf32>, vector<1x256xf32>, vector<8x256xf32> -> vector<8x256xf32>
    %c17_i32 = arith.constant 17 : i32
    %47 = tpu.dynamic_rotate %41 by %c17_i32 dim 1 : vector<8x256xf32>, i32 -> vector<8x256xf32>
    %48 = arith.mulf %47, %46 : vector<8x256xf32>
    %49 = vector.extract_strided_slice %42 {offsets = [0, 1], sizes = [8, 1], strides = [1, 1]} : vector<8x9xf32> to vector<8x1xf32>
    %50 = vector.extract_strided_slice %43 {offsets = [1, 0], sizes = [1, 256], strides = [1, 1]} : vector<9x256xf32> to vector<1x256xf32>
    %cst_26 = arith.constant dense<0.000000e+00> : vector<8x256xf32>
    %51 = tpu.matmul %49, %50, %cst_26 {dimension_numbers = #tpu.dot_dimension_numbers<[1], [0], [0], [1], [0, 0, 1, 1], [], []>} : vector<8x1xf32>, vector<1x256xf32>, vector<8x256xf32> -> vector<8x256xf32>
    %c16_i32 = arith.constant 16 : i32
    %52 = tpu.dynamic_rotate %41 by %c16_i32 dim 1 : vector<8x256xf32>, i32 -> vector<8x256xf32>
    %53 = arith.mulf %52, %51 : vector<8x256xf32>
    %54 = arith.addf %48, %53 : vector<8x256xf32>
    %55 = vector.extract_strided_slice %42 {offsets = [0, 2], sizes = [8, 1], strides = [1, 1]} : vector<8x9xf32> to vector<8x1xf32>
    %56 = vector.extract_strided_slice %43 {offsets = [2, 0], sizes = [1, 256], strides = [1, 1]} : vector<9x256xf32> to vector<1x256xf32>
    %cst_27 = arith.constant dense<0.000000e+00> : vector<8x256xf32>
    %57 = tpu.matmul %55, %56, %cst_27 {dimension_numbers = #tpu.dot_dimension_numbers<[1], [0], [0], [1], [0, 0, 1, 1], [], []>} : vector<8x1xf32>, vector<1x256xf32>, vector<8x256xf32> -> vector<8x256xf32>
    %c15_i32 = arith.constant 15 : i32
    %58 = tpu.dynamic_rotate %41 by %c15_i32 dim 1 : vector<8x256xf32>, i32 -> vector<8x256xf32>
    %59 = arith.mulf %58, %57 : vector<8x256xf32>
    %60 = arith.addf %54, %59 : vector<8x256xf32>
    %61 = vector.extract_strided_slice %42 {offsets = [0, 3], sizes = [8, 1], strides = [1, 1]} : vector<8x9xf32> to vector<8x1xf32>
    %62 = vector.extract_strided_slice %43 {offsets = [3, 0], sizes = [1, 256], strides = [1, 1]} : vector<9x256xf32> to vector<1x256xf32>
    %cst_28 = arith.constant dense<0.000000e+00> : vector<8x256xf32>
    %63 = tpu.matmul %61, %62, %cst_28 {dimension_numbers = #tpu.dot_dimension_numbers<[1], [0], [0], [1], [0, 0, 1, 1], [], []>} : vector<8x1xf32>, vector<1x256xf32>, vector<8x256xf32> -> vector<8x256xf32>
    %c1_i32 = arith.constant 1 : i32
    %64 = tpu.dynamic_rotate %41 by %c1_i32 dim 1 : vector<8x256xf32>, i32 -> vector<8x256xf32>
    %65 = arith.mulf %64, %63 : vector<8x256xf32>
    %66 = arith.addf %60, %65 : vector<8x256xf32>
    %67 = vector.extract_strided_slice %42 {offsets = [0, 4], sizes = [8, 1], strides = [1, 1]} : vector<8x9xf32> to vector<8x1xf32>
    %68 = vector.extract_strided_slice %43 {offsets = [4, 0], sizes = [1, 256], strides = [1, 1]} : vector<9x256xf32> to vector<1x256xf32>
    %cst_29 = arith.constant dense<0.000000e+00> : vector<8x256xf32>
    %69 = tpu.matmul %67, %68, %cst_29 {dimension_numbers = #tpu.dot_dimension_numbers<[1], [0], [0], [1], [0, 0, 1, 1], [], []>} : vector<8x1xf32>, vector<1x256xf32>, vector<8x256xf32> -> vector<8x256xf32>
    %70 = arith.mulf %41, %69 : vector<8x256xf32>
    %71 = arith.addf %66, %70 : vector<8x256xf32>
    %72 = vector.extract_strided_slice %42 {offsets = [0, 5], sizes = [8, 1], strides = [1, 1]} : vector<8x9xf32> to vector<8x1xf32>
    %73 = vector.extract_strided_slice %43 {offsets = [5, 0], sizes = [1, 256], strides = [1, 1]} : vector<9x256xf32> to vector<1x256xf32>
    %cst_30 = arith.constant dense<0.000000e+00> : vector<8x256xf32>
    %74 = tpu.matmul %72, %73, %cst_30 {dimension_numbers = #tpu.dot_dimension_numbers<[1], [0], [0], [1], [0, 0, 1, 1], [], []>} : vector<8x1xf32>, vector<1x256xf32>, vector<8x256xf32> -> vector<8x256xf32>
    %c255_i32 = arith.constant 255 : i32
    %75 = tpu.dynamic_rotate %41 by %c255_i32 dim 1 : vector<8x256xf32>, i32 -> vector<8x256xf32>
    %76 = arith.mulf %75, %74 : vector<8x256xf32>
    %77 = arith.addf %71, %76 : vector<8x256xf32>
    %78 = vector.extract_strided_slice %42 {offsets = [0, 6], sizes = [8, 1], strides = [1, 1]} : vector<8x9xf32> to vector<8x1xf32>
    %79 = vector.extract_strided_slice %43 {offsets = [6, 0], sizes = [1, 256], strides = [1, 1]} : vector<9x256xf32> to vector<1x256xf32>
    %cst_31 = arith.constant dense<0.000000e+00> : vector<8x256xf32>
    %80 = tpu.matmul %78, %79, %cst_31 {dimension_numbers = #tpu.dot_dimension_numbers<[1], [0], [0], [1], [0, 0, 1, 1], [], []>} : vector<8x1xf32>, vector<1x256xf32>, vector<8x256xf32> -> vector<8x256xf32>
    %c241_i32 = arith.constant 241 : i32
    %81 = tpu.dynamic_rotate %41 by %c241_i32 dim 1 : vector<8x256xf32>, i32 -> vector<8x256xf32>
    %82 = arith.mulf %81, %80 : vector<8x256xf32>
    %83 = arith.addf %77, %82 : vector<8x256xf32>
    %84 = vector.extract_strided_slice %42 {offsets = [0, 7], sizes = [8, 1], strides = [1, 1]} : vector<8x9xf32> to vector<8x1xf32>
    %85 = vector.extract_strided_slice %43 {offsets = [7, 0], sizes = [1, 256], strides = [1, 1]} : vector<9x256xf32> to vector<1x256xf32>
    %cst_32 = arith.constant dense<0.000000e+00> : vector<8x256xf32>
    %86 = tpu.matmul %84, %85, %cst_32 {dimension_numbers = #tpu.dot_dimension_numbers<[1], [0], [0], [1], [0, 0, 1, 1], [], []>} : vector<8x1xf32>, vector<1x256xf32>, vector<8x256xf32> -> vector<8x256xf32>
    %c240_i32 = arith.constant 240 : i32
    %87 = tpu.dynamic_rotate %41 by %c240_i32 dim 1 : vector<8x256xf32>, i32 -> vector<8x256xf32>
    %88 = arith.mulf %87, %86 : vector<8x256xf32>
    %89 = arith.addf %83, %88 : vector<8x256xf32>
    %90 = vector.extract_strided_slice %42 {offsets = [0, 8], sizes = [8, 1], strides = [1, 1]} : vector<8x9xf32> to vector<8x1xf32>
    %91 = vector.extract_strided_slice %43 {offsets = [8, 0], sizes = [1, 256], strides = [1, 1]} : vector<9x256xf32> to vector<1x256xf32>
    %cst_33 = arith.constant dense<0.000000e+00> : vector<8x256xf32>
    %92 = tpu.matmul %90, %91, %cst_33 {dimension_numbers = #tpu.dot_dimension_numbers<[1], [0], [0], [1], [0, 0, 1, 1], [], []>} : vector<8x1xf32>, vector<1x256xf32>, vector<8x256xf32> -> vector<8x256xf32>
    %c239_i32 = arith.constant 239 : i32
    %93 = tpu.dynamic_rotate %41 by %c239_i32 dim 1 : vector<8x256xf32>, i32 -> vector<8x256xf32>
    %94 = arith.mulf %93, %92 : vector<8x256xf32>
    %95 = arith.addf %89, %94 : vector<8x256xf32>
    %96 = vector.extract_strided_slice %95 {offsets = [0, 0], sizes = [4, 256], strides = [1, 1]} : vector<8x256xf32> to vector<4x256xf32>
    %97 = arith.truncf %96 : vector<4x256xf32> to vector<4x256xbf16>
    %98 = vector.extract_strided_slice %95 {offsets = [4, 0], sizes = [4, 256], strides = [1, 1]} : vector<8x256xf32> to vector<4x256xf32>
    %99 = arith.truncf %98 : vector<4x256xf32> to vector<4x256xbf16>
    %c0_34 = arith.constant 0 : index
    %c0_35 = arith.constant 0 : index
    %100 = vector.load %arg9[%c0_34, %c0_35] : memref<4x4xbf16, #tpu.memory_space<vmem>>, vector<4x4xbf16>
    %cst_36 = arith.constant dense<0.000000e+00> : vector<4x256xf32>
    %101 = tpu.matmul %100, %97, %cst_36 {dimension_numbers = #tpu.dot_dimension_numbers<[1], [0], [0], [1], [0, 0, 1, 1], [], []>} : vector<4x4xbf16>, vector<4x256xbf16>, vector<4x256xf32> -> vector<4x256xf32>
    %102 = vector.broadcast %11 : vector<4x1xf32> to vector<4x256xf32>
    %103 = arith.addf %101, %102 : vector<4x256xf32>
    %cst_37 = arith.constant 0.000000e+00 : f32
    %104 = vector.broadcast %cst_37 : f32 to vector<4x256xf32>
    %105 = arith.maximumf %103, %104 : vector<4x256xf32>
    %c0_38 = arith.constant 0 : index
    %c0_39 = arith.constant 0 : index
    %c0_40 = arith.constant 0 : index
    %106 = vector.load %arg12[%c0_38, %c0_39, %c0_40] : memref<1x4x256xf32, #tpu.memory_space<vmem>>, vector<1x4x256xf32>
    %107 = vector.shape_cast %106 : vector<1x4x256xf32> to vector<4x256xf32>
    %108 = vector.shape_cast %105 : vector<4x256xf32> to vector<1x4x256xf32>
    tpu.vector_store %arg12[%c0_38, %c0_39, %c0_40], %108 {strides = array<i32>} : memref<1x4x256xf32, #tpu.memory_space<vmem>>, vector<1x4x256xf32>,
    %c0_41 = arith.constant 0 : index
    %c0_42 = arith.constant 0 : index
    %109 = vector.load %arg10[%c0_41, %c0_42] : memref<4x4xbf16, #tpu.memory_space<vmem>>, vector<4x4xbf16>
    %cst_43 = arith.constant dense<0.000000e+00> : vector<4x256xf32>
    %110 = tpu.matmul %109, %99, %cst_43 {dimension_numbers = #tpu.dot_dimension_numbers<[1], [0], [0], [1], [0, 0, 1, 1], [], []>} : vector<4x4xbf16>, vector<4x256xbf16>, vector<4x256xf32> -> vector<4x256xf32>
    %111 = vector.broadcast %12 : vector<4x1xf32> to vector<4x256xf32>
    %112 = arith.addf %110, %111 : vector<4x256xf32>
    %cst_44 = arith.constant 0.000000e+00 : f32
    %113 = vector.broadcast %cst_44 : f32 to vector<4x256xf32>
    %114 = arith.maximumf %112, %113 : vector<4x256xf32>
    %c0_45 = arith.constant 0 : index
    %c0_46 = arith.constant 0 : index
    %c0_47 = arith.constant 0 : index
    %115 = vector.load %arg13[%c0_45, %c0_46, %c0_47] : memref<1x4x256xf32, #tpu.memory_space<vmem>>, vector<1x4x256xf32>
    %116 = vector.shape_cast %115 : vector<1x4x256xf32> to vector<4x256xf32>
    %117 = vector.shape_cast %114 : vector<4x256xf32> to vector<1x4x256xf32>
    tpu.vector_store %arg13[%c0_45, %c0_46, %c0_47], %117 {strides = array<i32>} : memref<1x4x256xf32, #tpu.memory_space<vmem>>, vector<1x4x256xf32>,
    return
  }
  func.func @transform_0(%arg0: i32) -> (i32, i32, i32) {
    %c0_i32 = arith.constant 0 : i32
    %c0_i32_0 = arith.constant 0 : i32
    %c0_i32_1 = arith.constant 0 : i32
    return %arg0, %c0_i32, %c0_i32_0 : i32, i32, i32
  }
  func.func @transform_1(%arg0: i32) -> (i32, i32, i32) {
    %c0_i32 = arith.constant 0 : i32
    %c0_i32_0 = arith.constant 0 : i32
    %c0_i32_1 = arith.constant 0 : i32
    return %arg0, %c0_i32, %c0_i32_0 : i32, i32, i32
  }
  func.func @transform_2(%arg0: i32) -> (i32, i32) {
    %c0_i32 = arith.constant 0 : i32
    %c0_i32_0 = arith.constant 0 : i32
    %c0_i32_1 = arith.constant 0 : i32
    return %c0_i32, %c0_i32_0 : i32, i32
  }
  func.func @transform_3(%arg0: i32) -> (i32, i32) {
    %c0_i32 = arith.constant 0 : i32
    %c0_i32_0 = arith.constant 0 : i32
    %c0_i32_1 = arith.constant 0 : i32
    return %c0_i32, %c0_i32_0 : i32, i32
  }
  func.func @transform_4(%arg0: i32) -> (i32, i32) {
    %c0_i32 = arith.constant 0 : i32
    %c0_i32_0 = arith.constant 0 : i32
    %c0_i32_1 = arith.constant 0 : i32
    return %c0_i32, %c0_i32_0 : i32, i32
  }
  func.func @transform_5(%arg0: i32) -> (i32, i32) {
    %c0_i32 = arith.constant 0 : i32
    %c0_i32_0 = arith.constant 0 : i32
    %c0_i32_1 = arith.constant 0 : i32
    return %c0_i32, %c0_i32_0 : i32, i32
  }
  func.func @transform_6(%arg0: i32) -> (i32, i32) {
    %c0_i32 = arith.constant 0 : i32
    %c0_i32_0 = arith.constant 0 : i32
    %c0_i32_1 = arith.constant 0 : i32
    return %c0_i32, %c0_i32_0 : i32, i32
  }
  func.func @transform_7(%arg0: i32) -> (i32, i32) {
    %c0_i32 = arith.constant 0 : i32
    %c0_i32_0 = arith.constant 0 : i32
    %c0_i32_1 = arith.constant 0 : i32
    return %c0_i32, %c0_i32_0 : i32, i32
  }
  func.func @transform_8(%arg0: i32) -> (i32, i32) {
    %c0_i32 = arith.constant 0 : i32
    %c0_i32_0 = arith.constant 0 : i32
    %c0_i32_1 = arith.constant 0 : i32
    return %c0_i32, %c0_i32_0 : i32, i32
  }
  func.func @transform_9(%arg0: i32) -> (i32, i32) {
    %c0_i32 = arith.constant 0 : i32
    %c0_i32_0 = arith.constant 0 : i32
    %c0_i32_1 = arith.constant 0 : i32
    return %c0_i32, %c0_i32_0 : i32, i32
  }
  func.func @transform_10(%arg0: i32) -> (i32, i32) {
    %c0_i32 = arith.constant 0 : i32
    %c0_i32_0 = arith.constant 0 : i32
    %c0_i32_1 = arith.constant 0 : i32
    return %c0_i32, %c0_i32_0 : i32, i32
  }
  func.func @transform_11(%arg0: i32) -> (i32, i32, i32) {
    %c0_i32 = arith.constant 0 : i32
    %c0_i32_0 = arith.constant 0 : i32
    %c0_i32_1 = arith.constant 0 : i32
    return %arg0, %c0_i32, %c0_i32_0 : i32, i32, i32
  }
  func.func @transform_12(%arg0: i32) -> (i32, i32, i32) {
    %c0_i32 = arith.constant 0 : i32
    %c0_i32_0 = arith.constant 0 : i32
    %c0_i32_1 = arith.constant 0 : i32
    return %arg0, %c0_i32, %c0_i32_0 : i32, i32, i32
  }
}

</mosaic_0001>

<bundles_post_ra>
// kernel: forward.1
= control target key start
LH: loop header
LB: loop body
LE: loop exit
PB: predicated region body
PF: predicated region fallthrough
CT: control target
= control target key end

     0   :  { %s2179_s21 = smov 0   ;;  %s2428_s0 = inlined_call_operand.vmem [shape: f32[2,8,256], index: 0, kind: input, shape index: {}]   ;;  %s2429_s1 = inlined_call_operand.vmem [shape: f32[2,8,256], index: 1, kind: input, shape index: {}]   ;;  %s2430_s2 = inlined_call_operand.vmem [shape: bf16[256,9], index: 2, kind: input, shape index: {}]   ;;  %s2431_s3 = inlined_call_operand.vmem [shape: f32[9,256], index: 3, kind: input, shape index: {}]   ;;  %s2432_s4 = inlined_call_operand.vmem [shape: bf16[4,8], index: 4, kind: input, shape index: {}]   ;;  %s2433_s5 = inlined_call_operand.vmem [shape: bf16[4,8], index: 5, kind: input, shape index: {}]   ;;  %s2434_s6 = inlined_call_operand.vmem [shape: bf16[4,8], index: 6, kind: input, shape index: {}]   ;;  %s2435_s7 = inlined_call_operand.vmem [shape: bf16[4,8], index: 7, kind: input, shape index: {}]   ;;  %s2436_s8 = inlined_call_operand.vmem [shape: bf16[4,4], index: 8, kind: input, shape index: {}]   ;;  %s2437_s9 = inlined_call_operand.vmem [shape: bf16[4,4], index: 9, kind: input, shape index: {}]   ;;  %s2438_s10 = inlined_call_operand.vmem [shape: f32[4,8], index: 10, kind: input, shape index: {}]   ;;  %s2439_s11 = inlined_call_operand.vmem [shape: f32[2,4,256], index: 11, kind: output, shape index: {0}]   ;;  %s2440_s12 = inlined_call_operand.vmem [shape: f32[2,4,256], index: 12, kind: output, shape index: {1}]  }
   0x1 LB: > { %s1919_s22 = sadd.s32 4294967295, %s2089_s21   ;;  %p1923_p0 = scmp.ge.s32.totalorder %s2089_s21, 1  ;;  %s2089_s21 = sphi %s2179_s21, %s23_s21  }
   0x2   : > { %p375_p1 = scmp.lt.s32.totalorder %s2089_s21, 3 }
   0x4   : > { %p376_p2 = pnand %p1923_p0, %p375_p1 }
   0x5   : > { %v2067_v0 = vld [vmem:[%s2430_s2 + $0x40] sm:$0xff] (!%p376_p2)   ;;  %v2069_v2 = vld [vmem:[%s2430_s2 + $0x48] sm:$0xff] (!%p376_p2)   ;;  %p427_p3 = scmp.lt.s32.totalorder (!%p376_p2), %s1919_s22, 1  ;;  %v2071_v4 = vld [vmem:[%s2430_s2 + $0x50] sm:$0xff] (!%p376_p2)   ;;  %v2091_v22 = vmov (!%p376_p2), 0.0   ;;  %vm2092_vm0 = vmmov (!%p376_p2), 0  }
   0x6   : > { %379 = sbr.rel (%p376_p2) target bundleno = 1060 (0x424), region = 64  ;;  %v2068_v1 = vld [vmem:[%s2430_s2] sm:$0xff] (!%p376_p2)   ;;  %1991 = vmatprep.subr.bf16.mxu0 (!%p376_p2), %v2067_v0  ;;  %v2070_v3 = vld [vmem:[%s2430_s2 + $0x8] sm:$0xff] (!%p376_p2)   ;;  %v2072_v5 = vld [vmem:[%s2430_s2 + $0x10] sm:$0xff] (!%p376_p2)   ;;  %2017 = vmatprep.subr.bf16.mxu1 (!%p376_p2), %v2091_v22  ;;  %v2093_v24 = vmov (!%p376_p2), 0   ;;  %v2094_v25 = vmov (!%p376_p2), 1  }
   0x7   : > { %1992 = vmatpush3.bf16.msra.mxu0 (!%p376_p2), %v2068_v1  ;;  %v2073_v6 = vld [vmem:[%s2430_s2 + $0x58] sm:$0xff] (!%p376_p2)   ;;  %v2075_v8 = vld [vmem:[%s2430_s2 + $0x60] sm:$0xff] (!%p376_p2)   ;;  %v2077_v10 = vld [vmem:[%s2430_s2 + $0x68] sm:$0xff] (!%p376_p2)   ;;  %2019 = vmatprep.mubr.msk.bf16.mxu1 (!%p376_p2), %vm2092_vm0, %v2091_v22  ;;  %vm640_vm1 = vcmask (!%p376_p2), 1043456   ;;  %vm636_vm2 = vcmask (!%p376_p2), 64512   ;;  %vm869_vm3 = vcmask (!%p376_p2), 1040384  }
   0x8   : > { %1993 = vmatprep.subr.bf16.mxu0 (!%p376_p2), %v2069_v2  ;;  %v2074_v7 = vld [vmem:[%s2430_s2 + $0x18] sm:$0xff] (!%p376_p2)   ;;  %v2076_v9 = vld [vmem:[%s2430_s2 + $0x20] sm:$0xff] (!%p376_p2)   ;;  %v2078_v14 = vld [vmem:[%s2430_s2 + $0x28] sm:$0xff] (!%p376_p2)   ;;  %2060 = vset.pattern.permute.xlu0 (!%p376_p2), %v2093_v24  ;;  %v2095_v48 = vmov (!%p376_p2), 3   ;;  %v2096_v51 = vmov (!%p376_p2), 2   ;;  %vm865_vm4 = vcmask (!%p376_p2), 7168  }
   0x9   : > { %v2079_v15 = vld [vmem:[%s2430_s2 + $0x70] sm:$0xff] (!%p376_p2)   ;;  %v2081_v17 = vld [vmem:[%s2430_s2 + $0x78] sm:$0xff] (!%p376_p2)   ;;  %v2251_v23 = vld [vmem:[%s2438_s10] sm:$0xf] (!%p376_p2)  ;;  %2062 = vset.pattern.permute.xlu1 (!%p376_p2), %v2095_v48  ;;  %s2097_s29 = smov (!%p376_p2), 124   ;;  %s2098_s30 = smov (!%p376_p2), 127  }
   0xa   : > { %v2080_v16 = vld [vmem:[%s2430_s2 + $0x30] sm:$0xff] (!%p376_p2)   ;;  %v2082_v18 = vld [vmem:[%s2430_s2 + $0x38] sm:$0xff] (!%p376_p2)   ;;  %633 = vperm.xlu0 (!%p376_p2), %2060, %v2251_v23   ;;  %v630_v35 = vld [vmem:[%s2432_s4] sm:$0x3] (!%p376_p2)  ;;  %s2099_s14 = smov (!%p376_p2), 122   ;;  %s2100_s15 = smov (!%p376_p2), 126  }
   0xb   : > { %1994 = vmatpush3.bf16.msra.mxu0 (!%p376_p2), %v2070_v3  ;;  %v684_v39 = vld [vmem:[%s2433_s5] sm:$0x3] (!%p376_p2)  ;;  %v2287_v46 = vld [vmem:[%s2431_s3 + $0x8] sm:$0xff] (!%p376_p2)  ;;  %s2103_s16 = smov (!%p376_p2), 123   ;;  %s2104_s17 = smov (!%p376_p2), 121   ;;  %vm1698_vm13 = vcmask (!%p376_p2), 1041408  }
   0xc   : > { %1995 = vmatprep.subr.bf16.mxu0 (!%p376_p2), %v2071_v4  ;;  %v735_v43 = vld [vmem:[%s2434_s6] sm:$0x3] (!%p376_p2)  ;;  %v961_v49 = vrot.slane (!%p376_p2), %v2287_v46, 1  ;;  %v1053_v52 = vrot.slane (!%p376_p2), %v2287_v46, 2  ;;  %v1145_v58 = vrot.slane (!%p376_p2), %v2287_v46, 3  ;;  %s2105_s24 = smov (!%p376_p2), 17  }
   0xd   : > { %s2442_s22 = smov (!%p427_p3, %s1919_s22), 1  ;;  %v792_v45 = vld [vmem:[%s2435_s7] sm:$0x3]  ;;  %s2106_s25 = smov 16   ;;  %vm1694_vm14 = vcmask 31744  }
   0xe   : > { %s1987_s19 = sshll.u32 %s2442_s22, 4  ;;  %2061 = vset.pattern.permute.xlu0 %v2094_v25  ;;  %v2294_v47 = vld [vmem:[%s2431_s3] sm:$0xff]  ;;  %s2107_s26 = smov 15  }
   0xf   : > { %1996 = vmatpush3.bf16.msra.mxu0 %v2072_v5  ;;  %s431_s28 = scalar_lea.vmem %s2428_s0, %s1987_s19  ;;  %s436_s13 = scalar_lea.vmem %s2429_s1, %s1987_s19  ;;  %686 = vperm.xlu0 %2061, %v2251_v23   ;;  %v960_v50 = vrot.slane %v2294_v47, 1  ;;  %v1052_v2 = vrot.slane %v2294_v47, 2  ;;  %v1237_v5 = vrot.slane %v2287_v46, 4  ;;  %v1413_v25 = vrot.slane %v2294_v47, 6 }
  0x10   : > { %1997 = vmatprep.subr.bf16.mxu0 %v2073_v6  ;;  %v449_v11 = vld [vmem:[%s431_s28 + $0x8] sm:$0xff]  ;;  %v448_v19 = vld [vmem:[%s431_s28] sm:$0xff]  ;;  %s2101_s28 = smov 120   ;;  %s2108_s27 = smov 1  }
  0x11   : > { %v451_v12 = vld [vmem:[%s436_s13 + $0x8] sm:$0xff]  ;;  %v450_v20 = vld [vmem:[%s436_s13] sm:$0xff]  ;;  %v453_v36 = vpack.c.bf16 %v449_v11, %v449_v11  ;;  %v452_v38 = vpack.c.bf16 %v448_v19, %v448_v19  ;;  %s2102_s13 = smov 125  }
  0x12   : > { %v458_v13 = vpack.c.bf16 %v451_v12, %v449_v11  ;;  %v457_v21 = vpack.c.bf16 %v450_v20, %v448_v19  ;;  %v455_v40 = vpack.c.bf16 %v451_v12, %v451_v12  ;;  %v454_v42 = vpack.c.bf16 %v450_v20, %v450_v20 }
  0x13   : > { %1998 = vmatpush3.bf16.msra.mxu0 %v2074_v7  ;;  %v744_v41 = vsel %vm640_vm1, %v452_v38, 0  ;;  %2063 = vset.pattern.permute.xlu0 %v2096_v51 }
  0x14   : > { %1999 = vmatprep.subr.bf16.mxu0 %v2075_v8  ;;  %619 = vmatprep.mubr.bf16.mxu0 %v458_v13  ;;  %v801_v44 = vsel %vm640_vm1, %v454_v42, 0 }
  0x17   : > { %2000 = vmatpush3.bf16.msra.mxu0 %v2076_v9 }
  0x18   : > { %2001 = vmatprep.subr.bf16.mxu0 %v2077_v10 }
  0x1b   : > { %2002 = vmatpush3.bf16.msra.mxu0 %v2078_v14  ;;  %v1144_v14 = vrot.slane %v2294_v47, 3 }
  0x1c   : > { %2003 = vmatprep.subr.bf16.mxu0 %v2079_v15  ;;  %v1322_v15 = vrot.slane %v2287_v46, 5 }
  0x1f   : > { %2004 = vmatpush3.bf16.msra.mxu0 %v2080_v16 }
  0x20   : > { %2005 = vmatprep.subr.bf16.mxu0 %v2081_v17  ;;  %v1236_v17 = vrot.slane %v2294_v47, 4 }
  0x23   : > { %2006 = vmatpush3.bf16.msra.mxu0 %v2082_v18  ;;  %v1414_v18 = vrot.slane %v2287_v46, 6 }
  0x24   : > { %1957 = vmatprep.subr.msk.mxu0 %vm869_vm3, %v961_v49  ;;  %v2112_v49 = vmov 4  }
  0x26   : > { %620 = vmatmul.mubr.bf16.vlgmr.msra.gmra.mrb[0].mxu0 %v457_v21  ;;  %v1321_v21 = vrot.slane %v2294_v47, 5 }
  0x27   : > { %1032 = vmatprep.mubr.f32.mxu0 %v2091_v22  ;;  %1958 = vmatpush1.msk.msra.mxu0 %vm869_vm3, %v960_v50  ;;  %v2113_v50 = vmov 5  }
  0x28   : > { %1963 = vmatprep.subr.msk.mxu0 %vm869_vm3, %v1145_v58 }
  0x89   : > { %v634_v55 = vpop.permute.xlu0 %633 }
  0x8e   : > { %v687_v60 = vpop.permute.xlu0 %686 }
  0xf9   : > { %v2007_v26 = vpop.f32.mrb[0].mxu0 }
  0xfa   : > { %v2008_v27 = vpop.f32.mrb[1].mxu0 }
  0xfb   : > { %v2009_v28 = vadd.f32 %v2008_v27, %v2007_v26  ;;  %v2010_v29 = vpop.f32.mrb[2].mxu0  ;;  %v1506_v27 = vrot.slane %v2287_v46, 7 }
  0xfc   : > { %v2011_v30 = vpop.f32.mrb[3].mxu0 }
  0xfd   : > { %v628_v31 = vpack.c.bf16 %v2009_v28, %v2009_v28  ;;  %v2012_v32 = vadd.f32 %v2011_v30, %v2010_v29  ;;  %v864_v28 = vld [vmem:[%s2431_s3 + $0x18] sm:$0x1]  ;;  %v1505_v30 = vrot.slane %v2294_v47, 7 }
  0xff   : > { %v629_v33 = vpack.c.bf16 %v2012_v32, %v2012_v32  ;;  %v642_v34 = vsel %vm640_vm1, %v628_v31, 0  ;;  %v863_v32 = vld [vmem:[%s2431_s3 + $0x10] sm:$0x1] }
 0x100   : > { %2018 = vmatpush3.bf16.msra.mxu1 %v642_v34 }
 0x101   : > { %2023 = vmatprep.subr.bf16.mxu1 %v2091_v22  ;;  %v693_v37 = vsel %vm640_vm1, %v629_v33, 0 }
 0x103   : > { %2020 = vmatmul.mubr.msk.bf16.vlgmr.msra.gmra.mrb[0].mxu1 %vm636_vm2, %v630_v35 }
 0x104   : > { %2024 = vmatpush3.bf16.msra.mxu1 %v693_v37  ;;  %2025 = vmatprep.mubr.msk.bf16.mxu1 %vm2092_vm0, %v2091_v22 }
 0x105   : > { %1950 = vmatprep.subr.msk.bf16.mxu1 %vm640_vm1, %v453_v36 }
 0x10b   : > { %2026 = vmatmul.mubr.msk.bf16.vlgmr.msra.gmra.mrb[4].mxu1 %vm636_vm2, %v684_v39 }
 0x10c   : > { %750 = vmatpush1.bf16.msra.mxu1 %v744_v41  ;;  %781 = vmatprep.mubr.bf16.mxu1 %v2093_v24 }
 0x10d   : > { %1952 = vmatprep.subr.msk.bf16.mxu1 %vm640_vm1, %v455_v40 }
 0x113   : > { %1951 = vmatmul.mubr.msk.bf16.vlgmr.msra.gmra.mrb[8].mxu1 %vm636_vm2, %v735_v43 }
 0x114   : > { %807 = vmatpush1.bf16.msra.mxu1 %v801_v44  ;;  %838 = vmatprep.mubr.bf16.mxu1 %v2093_v24 }
 0x115   : > { %1954 = vmatprep.subr.msk.mxu1 %vm869_vm3, %v2287_v46 }
 0x11b   : > { %1953 = vmatmul.mubr.msk.bf16.vlgmr.msra.gmra.mrb[12].mxu1 %vm636_vm2, %v792_v45 }
 0x11c   : > { %940 = vmatprep.mubr.f32.mxu1 %v2091_v22  ;;  %1955 = vmatpush1.msk.msra.mxu1 %vm869_vm3, %v2294_v47 }
 0x11d   : > { %1960 = vmatprep.subr.msk.mxu1 %vm869_vm3, %v1053_v52 }
 0x1d6   : > { %v678_v53 = vpop.f32.mrb[0].mxu1 }
 0x1d7   : > { %v2021_v54 = vpop.f32.mrb[1].mxu1  ;;  %v679_v59 = vadd.f32 %v678_v53, %v634_v55 }
 0x1d8   : > { %v681_v56 = vpop.f32.mrb[2].mxu1 }
 0x1d9   : > { %v2022_v57 = vpop.f32.mrb[3].mxu1  ;;  %v858_v62 = vrot.slane %v679_v59, 4 }
 0x1da   : > { %v951_v57 = vlaneseq }
 0x1de   : > { %v729_v61 = vpop.f32.mrb[4].mxu1 }
 0x1df   : > { %v730_v63 = vadd.f32 %v729_v61, %v687_v60  ;;  %v2027_v0 = vpop.f32.mrb[5].mxu1  ;;  %v2388_v60 = vand.u32 127, %v951_v57 }
 0x1e0   : > { %v732_v1 = vpop.f32.mrb[6].mxu1 }
 0x1e1   : > { %v860_v3 = vsel %vm640_vm1, %v730_v63, %v858_v62  ;;  %v2028_v4 = vpop.f32.mrb[7].mxu1  ;;  %vm953_vm5 = vcmp.lt.s32.totalorder %v2388_v60, 17  ;;  %vm1043_vm6 = vcmp.lt.s32.totalorder %v2388_v60, 16  ;;  %vm1135_vm7 = vcmp.lt.s32.totalorder %v2388_v60, 15 }
 0x1e2   : > { %1234 = vrot.lane.b32.xlu0 %v860_v3, %s2097_s29  ;;  %958 = vrot.lane.b32.xlu1 %v860_v3, %s2098_s30  ;;  %s2109_s29 = smov 113   ;;  %vm1227_vm8 = vcmp.lt.s32.totalorder %v2388_v60, 1  ;;  %vm1404_vm9 = vcmp.lt.s32.totalorder %v2388_v60, 127  ;;  %vm1496_vm10 = vcmp.lt.s32.totalorder %v2388_v60, 113  ;;  %vm1588_vm11 = vcmp.lt.s32.totalorder %v2388_v60, 112 }
 0x1e3   : > { %1956 = vmatmul.mubr.msk.f32.vlgmr.msra.gmra.mrb[16].mxu1 %vm865_vm4, %v860_v3  ;;  %vm1680_vm12 = vcmp.lt.s32.totalorder %v2388_v60, 111  ;;  %v1753_v60 = vld [vmem:[%s2437_s9] sm:$0x3] }
 0x1e4   : > { %1961 = vmatpush1.msk.msra.mxu1 %vm869_vm3, %v1052_v2  ;;  %1124 = vmatprep.mubr.f32.mxu1 %v2091_v22 }
 0x1e5   : > { %1966 = vmatprep.subr.msk.mxu1 %vm869_vm3, %v1237_v5 }
 0x1e6   : > { %1411 = vrot.lane.b32.xlu0 %v860_v3, %s2099_s14  ;;  %1050 = vrot.lane.b32.xlu1 %v860_v3, %s2100_s15  ;;  %v2314_v6 = vpop.f32.mrb[8].mxu1  ;;  %s2110_s14 = smov 112   ;;  %s2111_s15 = smov 111  }
 0x1e7   : > { %v2316_v7 = vpop.f32.mrb[9].mxu1 }
 0x1e8   : > { %v787_v8 = vpop.f32.mrb[10].mxu1 }
 0x1e9   : > { %v788_v9 = vpop.f32.mrb[11].mxu1 }
 0x1ea   : > { %1595 = vrot.lane.b32.xlu0 %v860_v3, %s2101_s28  ;;  %1142 = vrot.lane.b32.xlu1 %v860_v3, %s2102_s13 }
 0x1ee   : > { %1319 = vrot.lane.b32.xlu1 %v860_v3, %s2103_s16  ;;  %737 = vperm.xlu0 %2063, %v2251_v23   ;;  %v840_v10 = vpop.f32.mrb[12].mxu1 }
 0x1ef   : > { %v842_v11 = vpop.f32.mrb[13].mxu1 }
 0x1f0   : > { %v844_v12 = vpop.f32.mrb[14].mxu1 }
 0x1f1   : > { %v845_v13 = vpop.f32.mrb[15].mxu1 }
 0x1f2   : > { %1503 = vrot.lane.b32.xlu1 %v860_v3, %s2104_s17  ;;  %2064 = vset.pattern.permute.xlu0 %v2112_v49  ;;  %s1989_s17 = sshll.u32 %s2442_s22, 3 }
 0x1f3   : > { %s441_s19 = scalar_lea.vmem %s2439_s11, %s1989_s17  ;;  %s446_s22 = scalar_lea.vmem %s2440_s12, %s1989_s17 }
 0x1f6   : > { %794 = vperm.xlu1 %2062, %v2251_v23  }
 0x1fa   : > { %2065 = vset.pattern.permute.xlu1 %v2113_v50 }
 0x254   : > { %v959_v16 = vpop.permute.xlu1 %958  ;;  %v1235_v19 = vpop.permute.xlu0 %1234 }
 0x255   : > { %1959 = vmatmul.mubr.msk.f32.vlgmr.msra.gmra.mrb[4].mxu0 %vm865_vm4, %v959_v16 }
 0x256   : > { %1964 = vmatpush1.msk.msra.mxu0 %vm869_vm3, %v1144_v14  ;;  %1216 = vmatprep.mubr.f32.mxu0 %v2091_v22 }
 0x257   : > { %1969 = vmatprep.subr.msk.mxu0 %vm869_vm3, %v1322_v15 }
 0x258   : > { %v1051_v20 = vpop.permute.xlu1 %1050  ;;  %v1412_v29 = vpop.permute.xlu0 %1411 }
 0x259   : > { %1962 = vmatmul.mubr.msk.f32.vlgmr.msra.gmra.mrb[18].mxu1 %vm865_vm4, %v1051_v20 }
 0x25a   : > { %1967 = vmatpush1.msk.msra.mxu1 %vm869_vm3, %v1236_v17  ;;  %1308 = vmatprep.mubr.f32.mxu1 %v2091_v22 }
 0x25b   : > { %1972 = vmatprep.subr.msk.mxu1 %vm869_vm3, %v1414_v18 }
 0x25c   : > { %v1143_v26 = vpop.permute.xlu1 %1142  ;;  %v1596_v33 = vpop.permute.xlu0 %1595 }
 0x25d   : > { %1965 = vmatmul.mubr.msk.f32.vlgmr.msra.gmra.mrb[6].mxu0 %vm865_vm4, %v1143_v26  ;;  %1968 = vmatmul.mubr.msk.f32.vlgmr.msra.gmra.mrb[20].mxu1 %vm865_vm4, %v1235_v19 }
 0x25e   : > { %1970 = vmatpush1.msk.msra.mxu0 %vm869_vm3, %v1321_v21  ;;  %1393 = vmatprep.mubr.f32.mxu0 %v2091_v22 }
 0x25f   : > { %1973 = vmatpush1.msk.msra.mxu1 %vm869_vm3, %v1413_v25  ;;  %1485 = vmatprep.mubr.f32.mxu1 %v2091_v22 }
 0x260   : > { %v1320_v31 = vpop.permute.xlu1 %1319  ;;  %1975 = vmatprep.subr.msk.mxu0 %vm869_vm3, %v1506_v27  ;;  %1978 = vmatprep.subr.msk.mxu1 %vm869_vm3, %v864_v28 }
 0x261   : > { %1971 = vmatmul.mubr.msk.f32.vlgmr.msra.gmra.mrb[8].mxu0 %vm865_vm4, %v1320_v31  ;;  %1974 = vmatmul.mubr.msk.f32.vlgmr.msra.gmra.mrb[22].mxu1 %vm865_vm4, %v1412_v29 }
 0x262   : > { %1976 = vmatpush1.msk.msra.mxu0 %vm869_vm3, %v1505_v30  ;;  %1577 = vmatprep.mubr.f32.mxu0 %v2091_v22 }
 0x263   : > { %1979 = vmatpush1.msk.msra.mxu1 %vm869_vm3, %v863_v32  ;;  %1669 = vmatprep.mubr.f32.mxu1 %v2091_v22 }
 0x264   : > { %v1504_v34 = vpop.permute.xlu1 %1503 }
 0x265   : > { %1977 = vmatmul.mubr.msk.f32.vlgmr.msra.gmra.mrb[10].mxu0 %vm865_vm4, %v1504_v34  ;;  %1980 = vmatmul.mubr.msk.f32.vlgmr.msra.gmra.mrb[24].mxu1 %vm865_vm4, %v1596_v33 }
 0x266   : > { %1737 = vmatprep.mubr.bf16.mxu0 %v2093_v24  ;;  %1803 = vmatprep.mubr.bf16.mxu1 %v2093_v24 }
 0x26d   : > { %v738_v35 = vpop.permute.xlu0 %737 }
 0x26e   : > { %v784_v36 = vadd.f32 %v2314_v6, %v738_v35  ;;  %v786_v37 = vadd.f32 %v2316_v7, %v738_v35 }
 0x270   : > { %v790_v22 = vmax.f32 %v784_v36, 0.0  ;;  %v791_v42 = vmax.f32 %v786_v37, 0.0 }
 0x275   : > { %v795_v38 = vpop.permute.xlu1 %794 }
 0x276   : > { %v841_v39 = vadd.f32 %v840_v10, %v795_v38  ;;  %v843_v40 = vadd.f32 %v842_v11, %v795_v38 }
 0x278   : > { %v847_v41 = vmax.f32 %v841_v39, 0.0  ;;  %v848_v43 = vmax.f32 %v843_v40, 0.0 }
 0x27a   : > { %v851_v44 = vrot.slane %v847_v41, 4  ;;  %v852_v45 = vrot.slane %v848_v43, 4 }
 0x27c   : > { %v2363_v46 = vsel %vm640_vm1, %v790_v22, %v851_v44  ;;  %v2366_v47 = vsel %vm640_vm1, %v791_v42, %v852_v45 }
 0x27d   : > { %947 = vrot.lane.b32.xlu1 %v2363_v46, %s2105_s24  ;;  %1039 = vrot.lane.b32.xlu0 %v2363_v46, %s2106_s25 }
 0x281   : > { %949 = vrot.lane.b32.xlu1 %v2366_v47, %s2105_s24  ;;  %1131 = vrot.lane.b32.xlu0 %v2363_v46, %s2107_s26 }
 0x285   : > { %1041 = vrot.lane.b32.xlu1 %v2366_v47, %s2106_s25  ;;  %1223 = vrot.lane.b32.xlu0 %v2363_v46, %s2108_s27 }
 0x289   : > { %1133 = vrot.lane.b32.xlu1 %v2366_v47, %s2107_s26  ;;  %1400 = vrot.lane.b32.xlu0 %v2363_v46, %s2098_s30 }
 0x28d   : > { %1225 = vrot.lane.b32.xlu1 %v2366_v47, %s2108_s27  ;;  %1492 = vrot.lane.b32.xlu0 %v2363_v46, %s2109_s29 }
 0x291   : > { %1402 = vrot.lane.b32.xlu1 %v2366_v47, %s2098_s30  ;;  %1584 = vrot.lane.b32.xlu0 %v2363_v46, %s2110_s14 }
 0x295   : > { %1494 = vrot.lane.b32.xlu1 %v2366_v47, %s2109_s29  ;;  %1676 = vrot.lane.b32.xlu0 %v2363_v46, %s2111_s15 }
 0x299   : > { %1586 = vrot.lane.b32.xlu1 %v2366_v47, %s2110_s14  ;;  %1691 = vperm.xlu0 %2064, %v2251_v23  }
 0x29d   : > { %1678 = vrot.lane.b32.xlu1 %v2366_v47, %s2111_s15  ;;  %2066 = vset.pattern.permute.xlu0 %v2113_v50 }
 0x2a1   : > { %1755 = vperm.xlu1 %2065, %v2251_v23  }
 0x2b6   : > { %v942_v24 = vpop.f32.mrb[16].mxu1 }
 0x2b7   : > { %v944_v48 = vpop.f32.mrb[17].mxu1 }
 0x2ef   : > { %v948_v51 = vpop.permute.xlu1 %947  ;;  %v1040_v53 = vpop.permute.xlu0 %1039 }
 0x2f3   : > { %v950_v52 = vpop.permute.xlu1 %949  ;;  %v1132_v55 = vpop.permute.xlu0 %1131 }
 0x2f4   : > { %v955_v63 = vsel %vm953_vm5, %v950_v52, %v948_v51  ;;  %v954_v23 = vsel %vm953_vm5, %v948_v51, %v950_v52 }
 0x2f5   : > { %v956_v3 = vmul.f32 %v955_v63, %v942_v24  ;;  %v957_v8 = vmul.f32 %v954_v23, %v944_v48 }
 0x2f7   : > { %v1042_v54 = vpop.permute.xlu1 %1041  ;;  %v1224_v58 = vpop.permute.xlu0 %1223 }
 0x2f8   : > { %v1045_v2 = vsel %vm1043_vm6, %v1042_v54, %v1040_v53  ;;  %v1044_v7 = vsel %vm1043_vm6, %v1040_v53, %v1042_v54 }
 0x2fb   : > { %v1134_v56 = vpop.permute.xlu1 %1133  ;;  %v1401_v61 = vpop.permute.xlu0 %1400 }
 0x2fc   : > { %v1137_v13 = vsel %vm1135_vm7, %v1134_v56, %v1132_v55  ;;  %v1136_v16 = vsel %vm1135_vm7, %v1132_v55, %v1134_v56 }
 0x2ff   : > { %v1226_v59 = vpop.permute.xlu1 %1225  ;;  %v1493_v0 = vpop.permute.xlu0 %1492 }
 0x300   : > { %v1229_v26 = vsel %vm1227_vm8, %v1226_v59, %v1224_v58  ;;  %v1228_v30 = vsel %vm1227_vm8, %v1224_v58, %v1226_v59 }
 0x303   : > { %v1403_v62 = vpop.permute.xlu1 %1402  ;;  %v1585_v18 = vpop.permute.xlu0 %1584 }
 0x304   : > { %v1405_v38 = vsel %vm1404_vm9, %v1401_v61, %v1403_v62  ;;  %v1406_v42 = vsel %vm1404_vm9, %v1403_v62, %v1401_v61 }
 0x307   : > { %v1495_v4 = vpop.permute.xlu1 %1494  ;;  %v1677_v24 = vpop.permute.xlu0 %1676 }
 0x308   : > { %v1497_v45 = vsel %vm1496_vm10, %v1493_v0, %v1495_v4 }
 0x30b   : > { %v1587_v19 = vpop.permute.xlu1 %1586 }
 0x30c   : > { %v1589_v54 = vsel %vm1588_vm11, %v1585_v18, %v1587_v19  ;;  %v1590_v59 = vsel %vm1588_vm11, %v1587_v19, %v1585_v18 }
 0x30f   : > { %v1679_v48 = vpop.permute.xlu1 %1678 }
 0x310   : > { %v1681_v63 = vsel %vm1680_vm12, %v1677_v24, %v1679_v48 }
 0x328   : > { %v1034_v1 = vpop.f32.mrb[4].mxu0 }
 0x329   : > { %v1046_v5 = vmul.f32 %v1045_v2, %v1034_v1  ;;  %v1036_v6 = vpop.f32.mrb[5].mxu0  ;;  %v1682_v2 = vsel %vm1680_vm12, %v1679_v48, %v1677_v24 }
 0x32a   : > { %v1047_v9 = vmul.f32 %v1044_v7, %v1036_v6 }
 0x32b   : > { %v1048_v10 = vadd.f32 %v1046_v5, %v956_v3 }
 0x32c   : > { %v1049_v11 = vadd.f32 %v1047_v9, %v957_v8  ;;  %v1126_v12 = vpop.f32.mrb[18].mxu1 }
 0x32d   : > { %v1138_v14 = vmul.f32 %v1137_v13, %v1126_v12  ;;  %v1128_v15 = vpop.f32.mrb[19].mxu1  ;;  %v1689_v13 = vld [vmem:[%s2436_s8] sm:$0x3] }
 0x32e   : > { %v1139_v17 = vmul.f32 %v1136_v16, %v1128_v15  ;;  %v1756_v16 = vpop.permute.xlu1 %1755 }
 0x32f   : > { %v1140_v20 = vadd.f32 %v1138_v14, %v1048_v10  ;;  %v1692_v14 = vpop.permute.xlu0 %1691 }
 0x330   : > { %v1141_v21 = vadd.f32 %v1139_v17, %v1049_v11  ;;  %v1218_v25 = vpop.f32.mrb[6].mxu0  ;;  %v1310_v27 = vpop.f32.mrb[20].mxu1 }
 0x331   : > { %v1230_v28 = vmul.f32 %v1229_v26, %v1218_v25  ;;  %v1220_v29 = vpop.f32.mrb[7].mxu0  ;;  %v1312_v31 = vpop.f32.mrb[21].mxu1  ;;  %v1315_v34 = vmul.f32 %v1310_v27, %v2363_v46 }
 0x332   : > { %v1231_v32 = vmul.f32 %v1228_v30, %v1220_v29  ;;  %v1316_v36 = vmul.f32 %v1312_v31, %v2366_v47  ;;  %v1498_v47 = vsel %vm1496_vm10, %v1495_v4, %v1493_v0 }
 0x333   : > { %v1232_v33 = vadd.f32 %v1230_v28, %v1140_v20 }
 0x334   : > { %v1233_v35 = vadd.f32 %v1231_v32, %v1141_v21  ;;  %v1395_v37 = vpop.f32.mrb[8].mxu0  ;;  %v1487_v39 = vpop.f32.mrb[22].mxu1 }
 0x335   : > { %v1317_v40 = vadd.f32 %v1315_v34, %v1232_v33  ;;  %v1407_v41 = vmul.f32 %v1405_v38, %v1395_v37  ;;  %v1397_v22 = vpop.f32.mrb[9].mxu0  ;;  %v1489_v43 = vpop.f32.mrb[23].mxu1  ;;  %v1499_v50 = vmul.f32 %v1497_v45, %v1487_v39 }
 0x336   : > { %v1318_v44 = vadd.f32 %v1316_v36, %v1233_v35  ;;  %v1408_v46 = vmul.f32 %v1406_v42, %v1397_v22  ;;  %v1500_v52 = vmul.f32 %v1498_v47, %v1489_v43 }
 0x337   : > { %v1409_v49 = vadd.f32 %v1407_v41, %v1317_v40 }
 0x338   : > { %v1410_v51 = vadd.f32 %v1408_v46, %v1318_v44  ;;  %v1579_v53 = vpop.f32.mrb[10].mxu0  ;;  %v1671_v55 = vpop.f32.mrb[24].mxu1 }
 0x339   : > { %v1501_v56 = vadd.f32 %v1499_v50, %v1409_v49  ;;  %v1591_v57 = vmul.f32 %v1589_v54, %v1579_v53  ;;  %v1581_v58 = vpop.f32.mrb[11].mxu0  ;;  %v1673_v61 = vpop.f32.mrb[25].mxu1  ;;  %v1683_v1 = vmul.f32 %v1681_v63, %v1671_v55 }
 0x33a   : > { %v1502_v62 = vadd.f32 %v1500_v52, %v1410_v51  ;;  %v1592_v23 = vmul.f32 %v1590_v59, %v1581_v58  ;;  %v1684_v4 = vmul.f32 %v1682_v2, %v1673_v61 }
 0x33b   : > { %v1593_v0 = vadd.f32 %v1591_v57, %v1501_v56 }
 0x33c   : > { %v1594_v3 = vadd.f32 %v1592_v23, %v1502_v62 }
 0x33d   : > { %v1685_v5 = vadd.f32 %v1683_v1, %v1593_v0 }
 0x33e   : > { %v1686_v6 = vadd.f32 %v1684_v4, %v1594_v3 }
 0x33f   : > { %v1687_v7 = vpack.c.bf16 %v1685_v5, %v1685_v5 }
 0x340   : > { %v1688_v8 = vpack.c.bf16 %v1686_v6, %v1686_v6 }
 0x341   : > { %v1760_v9 = vrot.slane %v1687_v7, 2  ;;  %v1700_v10 = vsel %vm1698_vm13, %v1687_v7, 0 }
 0x342   : > { %v1761_v11 = vrot.slane %v1688_v8, 2  ;;  %1981 = vmatprep.subr.msk.bf16.mxu0 %vm1698_vm13, %v1688_v8 }
 0x343   : > { %1706 = vmatpush1.bf16.msra.mxu0 %v1700_v10  ;;  %v1766_v12 = vsel %vm1698_vm13, %v1760_v9, 0 }
 0x344   : > { %1983 = vmatprep.subr.msk.bf16.mxu1 %vm1698_vm13, %v1761_v11 }
 0x345   : > { %1772 = vmatpush1.bf16.msra.mxu1 %v1766_v12 }
 0x346   : > { %1982 = vmatmul.mubr.msk.bf16.vlgmr.msra.gmra.mrb[12].mxu0 %vm1694_vm14, %v1689_v13 }
 0x348   : > { %1984 = vmatmul.mubr.msk.bf16.vlgmr.msra.gmra.mrb[28].mxu1 %vm1694_vm14, %v1753_v60 }
 0x419   : > { %v1739_v15 = vpop.f32.mrb[12].mxu0 }
 0x41a   : > { %v1741_v17 = vpop.f32.mrb[13].mxu0  ;;  %v1740_v18 = vadd.f32 %v1739_v15, %v1692_v14 }
 0x41b   : > { %v1743_v19 = vpop.f32.mrb[14].mxu0  ;;  %v1805_v20 = vpop.f32.mrb[28].mxu1  ;;  %v1742_v21 = vadd.f32 %v1741_v17, %v1692_v14 }
 0x41c   : > { %v1746_v25 = vmax.f32 %v1740_v18, 0.0  ;;  %v1806_v26 = vadd.f32 %v1805_v20, %v1756_v16  ;;  %v1744_v27 = vpop.f32.mrb[15].mxu0  ;;  %v1807_v28 = vpop.f32.mrb[29].mxu1 }
 0x41d   : > { %v1747_v29 = vmax.f32 %v1742_v21, 0.0  ;;  %v1808_v30 = vadd.f32 %v1807_v28, %v1756_v16  ;;  %v1809_v31 = vpop.f32.mrb[30].mxu1 }
 0x41e   : > { %v1812_v32 = vmax.f32 %v1806_v26, 0.0  ;;  %v1810_v33 = vpop.f32.mrb[31].mxu1 }
 0x41f   : > { %v1750_v34 = vcombine.low %v1746_v25, %v1747_v29  ;;  %v1813_v35 = vmax.f32 %v1808_v30, 0.0 }
 0x421   : > { %1752 = vst [vmem:[%s441_s19] sm:$0xff] %v1750_v34  ;;  %v1816_v36 = vcombine.low %v1812_v32, %v1813_v35 }
 0x423   : > { %1818 = vst [vmem:[%s446_s22] sm:$0xff] %v1816_v36 }
 0x424 PF: > { %s23_s21 = sadd.s32 1, %s2089_s21  }
 0x425   : > { %p20_p4 = scmp.ge.s32.totalorder %s23_s21, 4  }
 0x427   :  { %22 = sbr.rel (!%p20_p4) target bundleno = 1 (0x1), region = 109 }

</bundles_post_ra>
